<compile_context>
chip_gen: v5e
topology: v5e:2x2
jax: 0.10.0
libtpu: 0.0.40
codegen_flags: <defaults>
</compile_context>

<pallas_src>
import functools

import jax
import jax.numpy as jnp
import numpy as np
from jax.experimental import pallas as pl
from jax.experimental.pallas import tpu as pltpu


def _round_up(v, m):
    return ((v + m - 1) // m) * m


def rbf_kernel(x_ref, ct_ref, p_ref, o_ref, *, unroll_d):
    # x_ref : (TN, D)   tile of input points
    # ct_ref: (D, TO)   centres tile, transposed
    # p_ref : (2, TO)   row 0 = sigmas, row 1 = ||c||^2
    # o_ref : (TN, TO)  output tile (lane-dense)
    x = x_ref[...].astype(jnp.float32)           # (TN, D)
    ct = ct_ref[...].astype(jnp.float32)         # (D, TO)
    sig = p_ref[0:1, :]                          # (1, TO)

    if unroll_d:
        # Small D: unrolled VPU loop; everything stays on (TN, TO) tiles.
        d0 = x[:, 0:1] - ct[0:1, :]              # (TN,1)-(1,TO) -> (TN,TO)
        dist = d0 * d0
        for i in range(1, x.shape[1]):
            di = x[:, i:i + 1] - ct[i:i + 1, :]
            dist = dist + di * di
    else:
        # Large D: MXU expansion ||x||^2 + ||c||^2 - 2 x.c ; clamp cancellation.
        xc = jnp.dot(x, ct, preferred_element_type=jnp.float32)   # (TN, TO)
        x_sq = jnp.sum(x * x, axis=-1, keepdims=True)             # (TN, 1)
        c_sq = p_ref[1:2, :]                                       # (1, TO)
        dist = jnp.maximum(x_sq + c_sq - 2.0 * xc, 0.0)

    alpha = dist * sig                            # broadcast sigmas over rows
    o_ref[...] = jnp.exp(-(alpha * alpha)).astype(o_ref.dtype)


def rbf_layer(x, centres, sigmas, *, tn=512, to=512):
    """x: (1, N, in_features) -> (1, N, out_features)."""
    x2 = x[0]                                     # (N, D)
    n, d = x2.shape
    o = centres.shape[0]

    # Lane-dense padding: O tile is a multiple of 128, padded O is a multiple
    # of the O tile (so even the last O block stores full 128-lane vectors).
    o_min = _round_up(max(o, 128), 128)
    to_eff = min(_round_up(to, 128), o_min)
    o_pad = _round_up(o_min, to_eff)

    c_pad = jnp.zeros((o_pad, d), jnp.float32).at[:o, :].set(
        centres.astype(jnp.float32))
    ct = c_pad.T                                  # (D, O_pad), pre-transposed
    sig_pad = jnp.zeros((o_pad,), jnp.float32).at[:o].set(
        sigmas.astype(jnp.float32))
    c_sq = jnp.sum(c_pad * c_pad, axis=-1)        # (O_pad,)
    params = jnp.stack([sig_pad, c_sq], axis=0)   # (2, O_pad)

    # Row tile: big tiles amortize per-step overhead; clamp for small N.
    tn_eff = min(tn, _round_up(n, 8))
    tn_eff = max(8, (tn_eff // 8) * 8)

    grid = (pl.cdiv(n, tn_eff), o_pad // to_eff)

    unroll_d = d <= 8
    kernel = functools.partial(rbf_kernel, unroll_d=unroll_d)

    cost = pl.CostEstimate(
        flops=2 * n * o_pad * d + 3 * n * o_pad,
        transcendentals=n * o_pad,
        bytes_accessed=4 * (n * d + grid[0] * o_pad * (d + 2) + n * o_pad),
    )

    out2d = pl.pallas_call(
        kernel,
        out_shape=jax.ShapeDtypeStruct((n, o_pad), x.dtype),
        grid_spec=pltpu.PrefetchScalarGridSpec(
            num_scalar_prefetch=0,
            grid=grid,
            in_specs=[
                pl.BlockSpec((tn_eff, d), lambda i, j: (i, 0)),   # point tile
                pl.BlockSpec((d, to_eff), lambda i, j: (0, j)),   # centres^T
                pl.BlockSpec((2, to_eff), lambda i, j: (0, j)),   # sig / ||c||^2
            ],
            out_specs=pl.BlockSpec((tn_eff, to_eff), lambda i, j: (i, j)),
        ),
        compiler_params=pltpu.CompilerParams(
            dimension_semantics=("parallel", "parallel")),
        cost_estimate=cost,
    )(x2, ct, params)

    return out2d[:, :o][None, ...]                # drop pad lanes, re-add batch


def rbf_reference(x, centres, sigmas):
    """Pure-JAX reference mirroring the PyTorch forward exactly."""
    xi = x[0]                                     # (N, D)
    diff = xi[:, None, :] - centres[None, :, :]   # (N, O, D)
    dist = jnp.sum(diff * diff, axis=-1) * sigmas[None, :]
    return jnp.exp(-(dist * dist))[None, ...]


if __name__ == "__main__":
    key = jax.random.PRNGKey(0)
    k1, k2, k3, k4 = jax.random.split(key, 4)

    # --- Test 1: module-default init (VPU small-D path), coordinate input ---
    in_features, out_features, N = 3, 32, 200     # N not a tile multiple
    centres = jax.random.uniform(
        k1, (out_features, in_features), minval=-1.0, maxval=1.0,
        dtype=jnp.float32)                        # nn.init.uniform_(-1, 1)
    sigmas = jnp.full((out_features,), 10.0, dtype=jnp.float32)  # constant 10
    x = jax.random.normal(k2, (1, N, in_features), dtype=jnp.float32)

    out = rbf_layer(x, centres, sigmas, tn=64)    # small tile -> multi-step grid
    out = jax.block_until_ready(out)
    ref = rbf_reference(x, centres, sigmas)
    np.testing.assert_allclose(np.asarray(out), np.asarray(ref),
                               rtol=1e-5, atol=1e-6)
    assert out.shape == (1, N, out_features)

    # --- Test 2: larger feature dim (MXU expansion path), 2-D grid ---------
    in2, out2, N2 = 64, 256, 256
    centres2 = jax.random.uniform(
        k3, (out2, in2), minval=-1.0, maxval=1.0, dtype=jnp.float32)
    sigmas2 = jnp.full((out2,), 0.02, dtype=jnp.float32)  # learnable param
    x2 = jax.random.normal(k4, (1, N2, in2), dtype=jnp.float32)

    out_b = rbf_layer(x2, centres2, sigmas2, tn=128, to=128)  # grid (2, 2)
    out_b = jax.block_until_ready(out_b)
    ref_b = rbf_reference(x2, centres2, sigmas2)
    np.testing.assert_allclose(np.asarray(out_b), np.asarray(ref_b),
                               rtol=1e-5, atol=1e-5)
    assert out_b.shape == (1, N2, out2)

    print("KERNEL_OK")
</pallas_src>

<mosaic_0001>
module attributes {stable_mosaic.version = 11 : i64} {
  func.func @rbf_kernel(%arg0: i32, %arg1: i32, %arg2: memref<64x3xf32, #tpu.memory_space<vmem>>, %arg3: memref<3x128xf32, #tpu.memory_space<vmem>>, %arg4: memref<2x128xf32, #tpu.memory_space<vmem>>, %arg5: memref<64x128xf32, #tpu.memory_space<vmem>>) attributes {dimension_semantics = [#tpu.dimension_semantics<parallel>, #tpu.dimension_semantics<parallel>], iteration_bounds = array<i64: 4, 1>, scalar_prefetch = 0 : i64, scratch_operands = 0 : i64, tpu.core_type = #tpu.core_type<tc>, window_params = [{transform_indices = @transform_0, window_bounds = array<i64: 64, 3>}, {transform_indices = @transform_1, window_bounds = array<i64: 3, 128>}, {transform_indices = @transform_2, window_bounds = array<i64: 2, 128>}, {transform_indices = @transform_3, window_bounds = array<i64: 64, 128>}]} {
    %c0 = arith.constant 0 : index
    %c0_0 = arith.constant 0 : index
    %0 = vector.load %arg2[%c0, %c0_0] : memref<64x3xf32, #tpu.memory_space<vmem>>, vector<64x3xf32>
    %c0_1 = arith.constant 0 : index
    %c0_2 = arith.constant 0 : index
    %1 = vector.load %arg3[%c0_1, %c0_2] : memref<3x128xf32, #tpu.memory_space<vmem>>, vector<3x128xf32>
    %c0_3 = arith.constant 0 : index
    %c0_4 = arith.constant 0 : index
    %2 = vector.load %arg4[%c0_3, %c0_4] : memref<2x128xf32, #tpu.memory_space<vmem>>, vector<1x128xf32>
    %3 = vector.extract_strided_slice %0 {offsets = [0, 0], sizes = [64, 1], strides = [1, 1]} : vector<64x3xf32> to vector<64x1xf32>
    %4 = vector.extract_strided_slice %1 {offsets = [0, 0], sizes = [1, 128], strides = [1, 1]} : vector<3x128xf32> to vector<1x128xf32>
    %5 = vector.broadcast %3 : vector<64x1xf32> to vector<64x128xf32>
    %6 = vector.broadcast %4 : vector<1x128xf32> to vector<64x128xf32>
    %7 = arith.subf %5, %6 : vector<64x128xf32>
    %8 = arith.mulf %7, %7 : vector<64x128xf32>
    %9 = vector.extract_strided_slice %0 {offsets = [0, 1], sizes = [64, 1], strides = [1, 1]} : vector<64x3xf32> to vector<64x1xf32>
    %10 = vector.extract_strided_slice %1 {offsets = [1, 0], sizes = [1, 128], strides = [1, 1]} : vector<3x128xf32> to vector<1x128xf32>
    %11 = vector.broadcast %9 : vector<64x1xf32> to vector<64x128xf32>
    %12 = vector.broadcast %10 : vector<1x128xf32> to vector<64x128xf32>
    %13 = arith.subf %11, %12 : vector<64x128xf32>
    %14 = arith.mulf %13, %13 : vector<64x128xf32>
    %15 = arith.addf %8, %14 : vector<64x128xf32>
    %16 = vector.extract_strided_slice %0 {offsets = [0, 2], sizes = [64, 1], strides = [1, 1]} : vector<64x3xf32> to vector<64x1xf32>
    %17 = vector.extract_strided_slice %1 {offsets = [2, 0], sizes = [1, 128], strides = [1, 1]} : vector<3x128xf32> to vector<1x128xf32>
    %18 = vector.broadcast %16 : vector<64x1xf32> to vector<64x128xf32>
    %19 = vector.broadcast %17 : vector<1x128xf32> to vector<64x128xf32>
    %20 = arith.subf %18, %19 : vector<64x128xf32>
    %21 = arith.mulf %20, %20 : vector<64x128xf32>
    %22 = arith.addf %15, %21 : vector<64x128xf32>
    %23 = vector.broadcast %2 : vector<1x128xf32> to vector<64x128xf32>
    %24 = arith.mulf %22, %23 : vector<64x128xf32>
    %25 = arith.mulf %24, %24 : vector<64x128xf32>
    %cst = arith.constant 0.000000e+00 : f32
    %26 = vector.broadcast %cst : f32 to vector<64x128xf32>
    %27 = arith.subf %26, %25 : vector<64x128xf32>
    %28 = math.exp %27 : vector<64x128xf32>
    %c0_5 = arith.constant 0 : index
    %c0_6 = arith.constant 0 : index
    %29 = vector.load %arg5[%c0_5, %c0_6] : memref<64x128xf32, #tpu.memory_space<vmem>>, vector<64x128xf32>
    tpu.vector_store %arg5[%c0_5, %c0_6], %28 {strides = array<i32>} : memref<64x128xf32, #tpu.memory_space<vmem>>, vector<64x128xf32>,
    return
  }
  func.func @transform_0(%arg0: i32, %arg1: i32) -> (i32, i32) {
    %c0_i32 = arith.constant 0 : i32
    %c0_i32_0 = arith.constant 0 : i32
    return %arg0, %c0_i32 : i32, i32
  }
  func.func @transform_1(%arg0: i32, %arg1: i32) -> (i32, i32) {
    %c0_i32 = arith.constant 0 : i32
    %c0_i32_0 = arith.constant 0 : i32
    return %c0_i32, %arg1 : i32, i32
  }
  func.func @transform_2(%arg0: i32, %arg1: i32) -> (i32, i32) {
    %c0_i32 = arith.constant 0 : i32
    %c0_i32_0 = arith.constant 0 : i32
    return %c0_i32, %arg1 : i32, i32
  }
  func.func @transform_3(%arg0: i32, %arg1: i32) -> (i32, i32) {
    %c0_i32 = arith.constant 0 : i32
    return %arg0, %arg1 : i32, i32
  }
}

</mosaic_0001>

<bundles_post_ra>
// kernel: tpu_custom_call.1
= control target key start
LH: loop header
LB: loop body
LE: loop exit
PB: predicated region body
PF: predicated region fallthrough
CT: control target
= control target key end

     0   :  { %8 = vsyncpa [#allocation3], 0  ;;  %s1021_s0 = inlined_call_operand.vmem [shape: f32[200,3], index: 0, kind: input, shape index: {}]   ;;  %s1022_s1 = inlined_call_operand.vmem [shape: f32[3,128], index: 1, kind: input, shape index: {}]   ;;  %s1023_s2 = inlined_call_operand.vmem [shape: f32[2,128], index: 2, kind: input, shape index: {}]   ;;  %s1024_s3 = inlined_call_operand.hbm [shape: f32[200,128], index: 3, kind: output, shape index: {}]  }
   0x1   :  { %10 = vsyncpa [#allocation3 + $0x1], 0  ;;  %s822_s12 = smov 0   ;;  %s824_s13 = smov 0  }
   0x2   :  { %s826_s14 = smov 0   ;;  %s828_s15 = smov 0  }
   0x3   :  { %s830_s16 = smov 0   ;;  %s832_s17 = smov 0  }
   0x4 LB: > { %s600_s18 = sadd.s32 4294967295, %s794_s17   ;;  %s601_s19 = sadd.s32 4294967294, %s794_s17   ;;  %s794_s17 = sphi %s832_s17, %s16_s17   ;;  %s790_s16 = sphi %s830_s16, %s1032_s16   ;;  %s786_s15 = sphi %s828_s15, %s1031_s15   ;;  %s782_s14 = sphi %s826_s14, %s1030_s14   ;;  %s778_s13 = sphi %s824_s13, %s1029_s13   ;;  %s774_s12 = sphi %s822_s12, %s1028_s12  }
   0x5   : > { %s28_s20 = sadd.s32 1, %s790_s16  ;;  %s115_s21 = sadd.s32 1, %s782_s14 }
   0x6   : > { %p30_p0 = scmp.ge.s32.totalorder %s28_s20, 4  ;;  %p125_p1 = scmp.ne.s32.totalorder %s782_s14, %s778_s13 }
   0x7   : > { %p126_p2 = scmp.eq.s32.totalorder %s600_s18, 3  ;;  %p131_p3 = scmp.ne.s32.totalorder %s778_s13, %s774_s12 }
   0x8   : > { %s1034_s20 = smov (%p30_p0, %s28_s20), 0  ;;  %p132_p5 = scmp.eq.s32.totalorder %s601_s19, 3 }
   0x9   : > { %p862_p4 = por %p126_p2, %p125_p1  ;;  %s110_s23 = ssub.s32 %s790_s16, %s1034_s20 }
   0xa   : > { %p606_p6 = scmp.ge.s32.totalorder %s794_s17, 1  ;;  %p113_p7 = scmp.eq.s32.totalorder %s110_s23, 0 }
   0xb   : > { %p869_p8 = por %p132_p5, %p131_p3  ;;  %p181_p9 = scmp.lt.s32.totalorder %s794_s17, 5 }
   0xc   : > { %s875_s25 = scalar_select %p113_p7, %s782_s14, %s115_s21  }
   0xd   : > { %p182_p10 = pnand %p606_p6, %p181_p9 }
   0xe   : > { %s878_s26 = sshll.u32 (!%p182_p10), %s786_s15, 3  ;;  %s214_s5 = sand.u32 (!%p182_p10), 1, %s778_s13  }
   0xf   : > { %185 = sbr.rel (%p182_p10) target bundleno = 259 (0x103), region = 32  ;;  %p222_p11 = scmp.lt.s32.totalorder (!%p182_p10), %s878_s26, 24 }
  0x10   : > { %s607_s10 = sshll.u32 (!%p182_p10), %s214_s5, 6  ;;  %s955_s18 = scalar_lea.sflag (!%p182_p10), [#allocation3], %s214_s5 }
  0x11   : > { %s921_s11 = scalar_lea.vmem (!%p182_p10), [#allocation2], %s607_s10 }
  0x14   : > { %v796_v0 = vmov 0   ;;  %s223_s27 = scalar_select %p222_p11, %s878_s26, 24  ;;  %v797_v9 = vmov 1   ;;  %v798_v10 = vmov 2   ;;  %v252_v17 = vld [vmem:[%s1022_s1] sm:$0x7] }
  0x15   : > { %681 = vset.pattern.permute.xlu2 %v796_v0  ;;  %680 = vset.pattern.permute.xlu1 %v796_v0  ;;  %v893_v20 = vperm.slane %v252_v17, 0  ;;  %v895_v21 = vperm.slane %v252_v17, 1  ;;  %v901_v28 = vperm.slane %v252_v17, 2  ;;  %v909_v35 = vld [vmem:[%s1023_s2] ss:$0 sm:$0xff]  ;;  %s483_s19 = ssub.s32 (%p862_p4), 25, %s878_s26 }
  0x16   : > { %679 = vset.pattern.permute.xlu0 %v796_v0  ;;  %s609_s28 = sshll.u32 %s223_s27, 3  ;;  %p484_p12 = scmp.lt.s32.totalorder (%p862_p4), %s483_s19, 8 }
  0x17   : > { %s225_s4 = scalar_lea.vmem %s1021_s0, %s609_s28 }
  0x18   : > { %v248_v1 = vld [vmem:[%s225_s4 + $0x20] sm:$0xff]  ;;  %v246_v2 = vld [vmem:[%s225_s4 + $0x10] sm:$0xff]  ;;  %v249_v4 = vld [vmem:[%s225_s4 + $0x28] sm:$0xff] }
  0x19   : > { %v244_v3 = vld [vmem:[%s225_s4] sm:$0xff]  ;;  %276 = vperm.xlu2 %681, %v248_v1   ;;  %266 = vperm.xlu1 %680, %v246_v2   ;;  %v247_v5 = vld [vmem:[%s225_s4 + $0x18] sm:$0xff]  ;;  %v245_v6 = vld [vmem:[%s225_s4 + $0x8] sm:$0xff] }
  0x1a   : > { %256 = vperm.xlu0 %679, %v244_v3   ;;  %v251_v7 = vld [vmem:[%s225_s4 + $0x38] sm:$0xff]  ;;  %v250_v8 = vld [vmem:[%s225_s4 + $0x30] sm:$0xff] }
  0x21   : > { %281 = vperm.xlu2 %681, %v249_v4   ;;  %271 = vperm.xlu1 %680, %v247_v5  }
  0x22   : > { %261 = vperm.xlu0 %679, %v245_v6  }
  0x29   : > { %682 = vset.pattern.permute.xlu2 %v797_v9  ;;  %291 = vperm.xlu1 %680, %v251_v7  }
  0x2a   : > { %286 = vperm.xlu0 %679, %v250_v8   ;;  %312 = vperm.xlu2 %682, %v244_v3  }
  0x31   : > { %684 = vset.pattern.permute.xlu1 %v797_v9 }
  0x32   : > { %683 = vset.pattern.permute.xlu0 %v797_v9  ;;  %320 = vperm.xlu1 %684, %v246_v2  }
  0x33   : > { %324 = vperm.xlu2 %682, %v247_v5   ;;  %316 = vperm.xlu0 %683, %v245_v6  }
  0x3a   : > { %328 = vperm.xlu1 %684, %v248_v1  }
  0x3b   : > { %332 = vperm.xlu2 %682, %v249_v4   ;;  %336 = vperm.xlu0 %683, %v250_v8  }
  0x42   : > { %340 = vperm.xlu1 %684, %v251_v7  }
  0x43   : > { %685 = vset.pattern.permute.xlu2 %v798_v10  ;;  %686 = vset.pattern.permute.xlu0 %v798_v10 }
  0x44   : > { %369 = vperm.xlu2 %685, %v244_v3   ;;  %373 = vperm.xlu0 %686, %v245_v6  }
  0x4a   : > { %687 = vset.pattern.permute.xlu1 %v798_v10 }
  0x4b   : > { %377 = vperm.xlu1 %687, %v246_v2  }
  0x4c   : > { %381 = vperm.xlu2 %685, %v247_v5   ;;  %393 = vperm.xlu0 %686, %v250_v8  }
  0x53   : > { %385 = vperm.xlu1 %687, %v248_v1  }
  0x54   : > { %389 = vperm.xlu2 %685, %v249_v4  }
  0x5b   : > { %397 = vperm.xlu1 %687, %v251_v7  }
  0x73   : > { %v886_v11 = vpop.permute.xlu2 %276 }
  0x7b   : > { %v282_v12 = vpop.permute.xlu2 %281 }
  0x7c   : > { %v300_v46 = vsub.f32 %v282_v12, %v893_v20 }
  0x7e   : > { %v308_v54 = vmul.f32 %v300_v46, %v300_v46 }
  0x84   : > { %v313_v13 = vpop.permute.xlu2 %312 }
  0x85   : > { %v344_v23 = vsub.f32 %v313_v13, %v895_v21 }
  0x87   : > { %v352_v25 = vmul.f32 %v344_v23, %v344_v23 }
  0x8b   : > { %v888_v14 = vpop.permute.xlu1 %266 }
  0x8c   : > { %v257_v15 = vpop.permute.xlu0 %256 }
  0x8d   : > { %v325_v16 = vpop.permute.xlu2 %324  ;;  %v295_v24 = vsub.f32 %v257_v15, %v893_v20 }
  0x8e   : > { %v347_v33 = vsub.f32 %v325_v16, %v895_v21 }
  0x8f   : > { %v303_v26 = vmul.f32 %v295_v24, %v295_v24 }
  0x90   : > { %v355_v39 = vmul.f32 %v347_v33, %v347_v33 }
  0x91   : > { %v360_v31 = vadd.f32 %v352_v25, %v303_v26 }
  0x93   : > { %v272_v18 = vpop.permute.xlu1 %271 }
  0x94   : > { %v262_v19 = vpop.permute.xlu0 %261  ;;  %v298_v34 = vsub.f32 %v272_v18, %v893_v20 }
  0x95   : > { %v333_v22 = vpop.permute.xlu2 %332  ;;  %v296_v2 = vsub.f32 %v262_v19, %v893_v20  ;;  %v297_v19 = vsub.f32 %v888_v14, %v893_v20 }
  0x96   : > { %v306_v40 = vmul.f32 %v298_v34, %v298_v34  ;;  %v349_v48 = vsub.f32 %v333_v22, %v895_v21 }
  0x97   : > { %v304_v9 = vmul.f32 %v296_v2, %v296_v2  ;;  %v305_v33 = vmul.f32 %v297_v19, %v297_v19 }
  0x98   : > { %v363_v47 = vadd.f32 %v355_v39, %v306_v40  ;;  %v357_v55 = vmul.f32 %v349_v48, %v349_v48 }
  0x9a   : > { %v365_v61 = vadd.f32 %v357_v55, %v308_v54 }
  0x9b   : > { %v899_v27 = vpop.permute.xlu1 %291 }
  0x9c   : > { %v287_v29 = vpop.permute.xlu0 %286 }
  0x9d   : > { %v301_v23 = vsub.f32 %v287_v29, %v893_v20 }
  0x9e   : > { %v370_v30 = vpop.permute.xlu2 %369 }
  0x9f   : > { %v401_v32 = vsub.f32 %v370_v30, %v901_v28 }
  0xa1   : > { %v409_v36 = vmul.f32 %v401_v32, %v401_v32 }
  0xa3   : > { %v417_v37 = vadd.f32 %v409_v36, %v360_v31 }
  0xa4   : > { %v321_v38 = vpop.permute.xlu1 %320 }
  0xa5   : > { %v426_v41 = vmul.f32 %v909_v35, %v417_v37  ;;  %v317_v42 = vpop.permute.xlu0 %316  ;;  %v346_v13 = vsub.f32 %v321_v38, %v895_v21  ;;  %v309_v37 = vmul.f32 %v301_v23, %v301_v23 }
  0xa6   : > { %v382_v43 = vpop.permute.xlu2 %381  ;;  %v345_v62 = vsub.f32 %v317_v42, %v895_v21 }
  0xa7   : > { %v434_v44 = vmul.f32 %v426_v41, %v426_v41  ;;  %v404_v45 = vsub.f32 %v382_v43, %v901_v28  ;;  %v354_v26 = vmul.f32 %v346_v13, %v346_v13 }
  0xa8   : > { %v353_v6 = vmul.f32 %v345_v62, %v345_v62 }
  0xa9   : > { %v442_v49 = vsub.f32 0.0, %v434_v44  ;;  %v412_v50 = vmul.f32 %v404_v45, %v404_v45  ;;  %v362_v39 = vadd.f32 %v354_v26, %v305_v33  ;;  %v299_v44 = vsub.f32 %v886_v11, %v893_v20 }
  0xaa   : > { %v361_v15 = vadd.f32 %v353_v6, %v304_v9 }
  0xab   : > { %v450_v51 = vmul.f32 1.442695, %v442_v49  ;;  %v420_v52 = vadd.f32 %v412_v50, %v363_v47 }
  0xac   : > { %v329_v53 = vpop.permute.xlu1 %328 }
  0xad   : > { %689 = vpow2.f32 %v450_v51  ;;  %v429_v56 = vmul.f32 %v909_v35, %v420_v52  ;;  %v337_v57 = vpop.permute.xlu0 %336  ;;  %v348_v29 = vsub.f32 %v329_v53, %v895_v21  ;;  %v307_v53 = vmul.f32 %v299_v44, %v299_v44 }
  0xae   : > { %v390_v58 = vpop.permute.xlu2 %389  ;;  %v350_v16 = vsub.f32 %v337_v57, %v895_v21 }
  0xaf   : > { %v437_v59 = vmul.f32 %v429_v56, %v429_v56  ;;  %v406_v60 = vsub.f32 %v390_v58, %v901_v28  ;;  %v356_v49 = vmul.f32 %v348_v29, %v348_v29 }
  0xb0   : > { %v358_v30 = vmul.f32 %v350_v16, %v350_v16 }
  0xb1   : > { %v445_v63 = vsub.f32 0.0, %v437_v59  ;;  %v414_v0 = vmul.f32 %v406_v60, %v406_v60  ;;  %v364_v57 = vadd.f32 %v356_v49, %v307_v53 }
  0xb2   : > { %v366_v41 = vadd.f32 %v358_v30, %v309_v37 }
  0xb3   : > { %v690_v1 = vpop.eup %689  ;;  %v456_v3 = vmul.f32 1.442695, %v445_v63  ;;  %v422_v4 = vadd.f32 %v414_v0, %v365_v61  ;;  %v302_v61 = vsub.f32 %v899_v27, %v893_v20 }
  0xb4   : > { %466 = vst [vmem:[%s921_s11] sm:$0xff] %v690_v1  ;;  %v341_v5 = vpop.permute.xlu1 %340 }
  0xb5   : > { %691 = vpow2.f32 %v456_v3  ;;  %v431_v7 = vmul.f32 %v909_v35, %v422_v4  ;;  %v351_v11 = vsub.f32 %v341_v5, %v895_v21  ;;  %v310_v21 = vmul.f32 %v302_v61, %v302_v61 }
  0xb6   : > { %v374_v8 = vpop.permute.xlu0 %373 }
  0xb7   : > { %v439_v10 = vmul.f32 %v431_v7, %v431_v7  ;;  %v402_v12 = vsub.f32 %v374_v8, %v901_v28  ;;  %v359_v2 = vmul.f32 %v351_v11, %v351_v11 }
  0xb9   : > { %v447_v17 = vsub.f32 0.0, %v439_v10  ;;  %v410_v18 = vmul.f32 %v402_v12, %v402_v12  ;;  %v367_v7 = vadd.f32 %v359_v2, %v310_v21 }
  0xbb   : > { %v692_v22 = vpop.eup %691  ;;  %v460_v24 = vmul.f32 1.442695, %v447_v17  ;;  %v418_v25 = vadd.f32 %v410_v18, %v361_v15 }
  0xbc   : > { %469 = vst [vmem:[%s921_s11 + $0x18] sm:$0xff] %v692_v22 }
  0xbd   : > { %693 = vpow2.f32 %v460_v24  ;;  %v427_v31 = vmul.f32 %v909_v35, %v418_v25  ;;  %v378_v32 = vpop.permute.xlu1 %377 }
  0xbe   : > { %v403_v34 = vsub.f32 %v378_v32, %v901_v28  ;;  %v394_v36 = vpop.permute.xlu0 %393 }
  0xbf   : > { %v435_v38 = vmul.f32 %v427_v31, %v427_v31  ;;  %v407_v14 = vsub.f32 %v394_v36, %v901_v28 }
  0xc0   : > { %v411_v40 = vmul.f32 %v403_v34, %v403_v34 }
  0xc1   : > { %v443_v42 = vsub.f32 0.0, %v435_v38  ;;  %v415_v43 = vmul.f32 %v407_v14, %v407_v14 }
  0xc2   : > { %v419_v45 = vadd.f32 %v411_v40, %v362_v39 }
  0xc3   : > { %v694_v46 = vpop.eup %693  ;;  %v452_v47 = vmul.f32 1.442695, %v443_v42  ;;  %v423_v48 = vadd.f32 %v415_v43, %v366_v41 }
  0xc4   : > { %471 = vst [vmem:[%s921_s11 + $0x28] sm:$0xff] %v694_v46  ;;  %v428_v50 = vmul.f32 %v909_v35, %v419_v45 }
  0xc5   : > { %695 = vpow2.f32 %v452_v47  ;;  %v432_v51 = vmul.f32 %v909_v35, %v423_v48  ;;  %v386_v52 = vpop.permute.xlu1 %385 }
  0xc6   : > { %v436_v54 = vmul.f32 %v428_v50, %v428_v50  ;;  %v405_v55 = vsub.f32 %v386_v52, %v901_v28 }
  0xc7   : > { %v440_v56 = vmul.f32 %v432_v51, %v432_v51 }
  0xc8   : > { %v444_v58 = vsub.f32 0.0, %v436_v54  ;;  %v413_v59 = vmul.f32 %v405_v55, %v405_v55 }
  0xc9   : > { %v448_v60 = vsub.f32 0.0, %v440_v56 }
  0xca   : > { %v454_v62 = vmul.f32 1.442695, %v444_v58  ;;  %v421_v63 = vadd.f32 %v413_v59, %v364_v57 }
  0xcb   : > { %v696_v0 = vpop.eup %695  ;;  %v462_v1 = vmul.f32 1.442695, %v448_v60 }
  0xcc   : > { %467 = vst [vmem:[%s921_s11 + $0x8] sm:$0xff] %v696_v0  ;;  %697 = vpow2.f32 %v454_v62  ;;  %v430_v3 = vmul.f32 %v909_v35, %v421_v63 }
  0xcd   : > { %699 = vpow2.f32 %v462_v1  ;;  %v398_v4 = vpop.permute.xlu1 %397 }
  0xce   : > { %v438_v5 = vmul.f32 %v430_v3, %v430_v3  ;;  %v408_v6 = vsub.f32 %v398_v4, %v901_v28 }
  0xd0   : > { %v446_v20 = vsub.f32 0.0, %v438_v5  ;;  %v416_v27 = vmul.f32 %v408_v6, %v408_v6 }
  0xd2   : > { %v698_v8 = vpop.eup %697  ;;  %v458_v9 = vmul.f32 1.442695, %v446_v20  ;;  %v424_v10 = vadd.f32 %v416_v27, %v367_v7 }
  0xd3   : > { %v700_v12 = vpop.eup %699  ;;  %468 = vst [vmem:[%s921_s11 + $0x10] sm:$0xff] %v698_v8 }
  0xd4   : > { %472 = vst [vmem:[%s921_s11 + $0x30] sm:$0xff] %v700_v12  ;;  %701 = vpow2.f32 %v458_v9  ;;  %v433_v13 = vmul.f32 %v909_v35, %v424_v10 }
  0xd6   : > { %v441_v15 = vmul.f32 %v433_v13, %v433_v13 }
  0xd8   : > { %v449_v16 = vsub.f32 0.0, %v441_v15 }
  0xda   : > { %v702_v17 = vpop.eup %701  ;;  %v464_v18 = vmul.f32 1.442695, %v449_v16 }
  0xdb   : > { %470 = vst [vmem:[%s921_s11 + $0x20] sm:$0xff] %v702_v17 }
  0xdc   : > { %703 = vpow2.f32 %v464_v18 }
  0xdf   : > { %481 = sbr.rel (!%p862_p4) target bundleno = 259 (0x103), region = 36 }
  0xe2   : > { %v704_v28 = vpop.eup %703 }
  0xe3   : > { %473 = vst [vmem:[%s921_s11 + $0x38] sm:$0xff] %v704_v28 }
  0xe4   : > { %s1036_s19 = smov (!%p484_p12, %s483_s19), 8 }
  0xe5   : > { %s612_s21 = sshll.u32 %s1036_s19, 3 }
  0xe6   : > { %s487_s23 = ssub.s32 64, %s612_s21 }
  0xe7   : > { %s488_s27 = sshll.u32 %s487_s23, 4 }
  0xe8   : > { %489 = vsyncadd %s955_s18, %s488_s27  ;;  %p964_p13 = scmp.ne.s32.totalorder %s612_s21, 0  ;;  %s619_s22 = sshll.u32 %s786_s15, 6 }
  0xe9   : > { %s493_s30 = scalar_lea.hbm %s1024_s3, %s619_s22  ;;  %s495_s4 = sshll.u32 %s921_s11, 4  ;;  %s973_s4 = int_to_ptr.vmem [resolvable:$true] %s495_s4 }
  0xea   : > { %s497_s5 = sshll.u32 %s493_s30, 4  ;;  %s616_s6 = sshll.u32 %s1036_s19, 7  ;;  %s975_s5 = int_to_ptr.hbm [resolvable:$true] %s497_s5 }
  0xeb   : > { %s705_s7 = sshra.s32 %s973_s4, 4  ;;  %s707_s8 = sshrl.u32 %s616_s6, 4  ;;  %s706_s7 = int_to_ptr.vmem [resolvable:$true] %s705_s7 }
  0xec   : > { %s712_s9 = scalar_lea.vmem %s706_s7, %s707_s8  ;;  %s799_s15 = smov [#allocation2]  }
  0xed   : > { %p713_p0 = scmp.ne.s32.totalorder %s706_s7, %s712_s9  ;;  %s716_s10 = scalar_lea.vmem %s799_s15, 128 }
  0xee   : > { %p718_p3 = scmp.lt.s32.totalorder %s716_s10, %s712_s9 }
  0xef   : > { %p714_p1 = pnand %p713_p0, %p964_p13 }
  0xf1   : > { %p715_p2 = pneg %p714_p1 }
  0xf3   : > { %p720_p4 = pnand %p718_p3, %p715_p2 }
  0xf5   : > { %723 = shalt.err (!%p720_p4)
}
  0xf6   : > { %s724_s11 = sshra.s32 %s975_s5, 4  ;;  %s735_s22 = scalar_lea.hbm %s1024_s3, 200  ;;  %s725_s11 = int_to_ptr.hbm [resolvable:$true] %s724_s11 }
  0xf7   : > { %s731_s21 = scalar_lea.hbm %s725_s11, %s707_s8  ;;  %p736_p9 = scmp.lt.s32.totalorder %s725_s11, %s1024_s3 }
  0xf8   : > { %p732_p5 = scmp.ne.s32.totalorder %s725_s11, %s731_s21  ;;  %p737_p10 = scmp.lt.s32.totalorder %s735_s22, %s731_s21 }
  0xfa   : > { %p733_p6 = pnand %p732_p5, %p964_p13  ;;  %p738_p11 = por %p737_p10, %p736_p9 }
  0xfc   : > { %p734_p7 = pneg %p733_p6 }
  0xfe   : > { %p739_p12 = pnand %p738_p11, %p734_p7 }
 0x100   : > { %742 = shalt.err (!%p739_p12)
}
 0x101   : > { %s800_s30 = smov 128   ;;  %s801_s7 = smov 8  }
 0x102   : > { %503 = dma.vmem_to_hbm [thread:$0]  (%p964_p13), %s973_s4, %s616_s6, %s975_s5, %s955_s18, %s800_s30, %s800_s30, %s801_s7  }
 0x103 PF: > { %p625_p0 = scmp.ge.s32.totalorder %s794_s17, 2  ;;  %s512_s8 = sand.u32 1, %s774_s12  }
 0x104   : > { %s513_s9 = scalar_lea.sflag [#allocation3], %s512_s8 }
 0x105   : > { %p622_p1 = pnand %p625_p0, %p869_p8 }
 0x107   : > { %p623_p2 = pneg %p622_p1 }
 0x109   : > { %769 = dma.done.wait (%p623_p2), %s513_s9, 1024  }
 0x10a   : > { %771 = vsyncadd (%p623_p2), %s513_s9, 4294966272  ;;  %s16_s17 = sadd.s32 1, %s794_s17   ;;  %s1028_s12 = smov %s778_s13 }
 0x10b   : > { %p13_p3 = scmp.ge.s32.totalorder %s16_s17, 6   ;;  %s1029_s13 = smov %s782_s14 }
 0x10c   : > { %s1030_s14 = smov %s875_s25  ;;  %s1031_s15 = smov %s790_s16 }
 0x10d   : > { %s1032_s16 = smov %s1034_s20  ;;  %15 = sbr.rel (!%p13_p3) target bundleno = 4 (0x4), region = 73 }
 0x112   :  { %519 = vsyncpa [#allocation3], 1 }
 0x113   :  { %521 = vsyncpa [#allocation3 + $0x1], 1 }

</bundles_post_ra>
